<compile_context>
chip_gen: v5e
topology: v5e:2x2
jax: 0.10.0
libtpu: 0.0.40
codegen_flags: <defaults>
</compile_context>

<pallas_src>
import functools

import jax
import jax.numpy as jnp
from jax import lax
from jax.experimental import pallas as pl
from jax.experimental.pallas import tpu as pltpu


# ----------------------------------------------------------------------------
# Fused kernel: phase 0 = conv + batch stats, phase 1 = BN fold + affine + ReLU
# ----------------------------------------------------------------------------
def fused_conv_bn_relu_kernel(x_ref, w_ref, gamma_ref, beta_ref, out_ref,
                              conv_sc, sum_sc, ssq_sc, scale_sc, shift_sc,
                              *, H, W, inv_count):
    """grid = (2, N): axis 0 = phase, axis 1 = batch element (both serial).

    x_ref:     (Cin, (H+2)*W + 2) H-padded, flattened, lane-dense input row
    w_ref:     (9, Cout, Cin)     per-tap weights, tap index = 3*kh + kw
    gamma_ref: (Cout, 1)          BN weight
    beta_ref:  (Cout, 1)          BN bias
    out_ref:   (Cout, H*W)        lane-dense channel-major output block
    conv_sc:   (N, Cout, H*W)     persistent conv intermediate (VMEM only)
    sum_sc/ssq_sc/scale_sc/shift_sc: (Cout, 1) per-channel scratch
    """
    p = pl.program_id(0)
    n = pl.program_id(1)
    HW = H * W
    Cout = out_ref.shape[0]

    # ---------------- phase 0: conv + partial batch statistics --------------
    @pl.when(p == 0)
    def _conv_and_stats():
        @pl.when(n == 0)
        def _init():
            sum_sc[...] = jnp.zeros_like(sum_sc)
            ssq_sc[...] = jnp.zeros_like(ssq_sc)

        # Output-column index (x mod W) for masking the horizontal taps that
        # would otherwise read across a row boundary of the flattened input.
        col = lax.broadcasted_iota(jnp.int32, (1, HW), 1) % W
        valid_left = col > 0            # kw == 0 reads column x-1
        valid_right = col < (W - 1)     # kw == 2 reads column x+1

        # Nine static lane-shifted views + nine tiny MXU matmuls (K = Cin),
        # accumulated in f32.  No patch matrix is ever materialized.
        acc = jnp.zeros((Cout, HW), jnp.float32)
        for kh in range(3):
            for kw in range(3):
                off = kh * W + kw                      # static lane shift
                xv = x_ref[:, off:off + HW]            # (Cin, HW)
                if kw == 0:
                    xv = jnp.where(valid_left, xv, 0.0)
                elif kw == 2:
                    xv = jnp.where(valid_right, xv, 0.0)
                acc = acc + lax.dot_general(
                    w_ref[3 * kh + kw], xv,
                    dimension_numbers=(((1,), (0,)), ((), ())),
                    preferred_element_type=jnp.float32)

        conv_sc[n] = acc
        # TODO(synk): for very large N*H*W switch to a shifted/Welford combine
        # to avoid E[x^2]-E[x]^2 cancellation; f32 is ample at these sizes.
        sum_sc[...] += jnp.sum(acc, axis=1, keepdims=True)
        ssq_sc[...] += jnp.sum(acc * acc, axis=1, keepdims=True)

    # ---------------- phase 1: BN fold + scale/shift + ReLU -----------------
    @pl.when(p == 1)
    def _bn_relu():
        @pl.when(n == 0)
        def _fold():
            mean = sum_sc[...] * inv_count
            var = jnp.maximum(ssq_sc[...] * inv_count - mean * mean, 0.0)
            g_inv = gamma_ref[...] * lax.rsqrt(var + 1e-5)  # eps = PyTorch BN
            scale_sc[...] = g_inv
            shift_sc[...] = beta_ref[...] - mean * g_inv

        y = conv_sc[n] * scale_sc[...] + shift_sc[...]
        out_ref[...] = jnp.maximum(y, 0.0)


# ----------------------------------------------------------------------------
# Wrapper
# ----------------------------------------------------------------------------
@jax.jit
def conv_block_forward(x_nchw, w_khkwcico, bias, gamma, beta):
    """x_nchw: (N, Cin, H, W) f32 -> (N, Cout, H, W) f32.

    Matches nn.Conv2d(3x3, stride 1, pad 1) + nn.BatchNorm2d (training-mode
    batch statistics, eps=1e-5) + ReLU.  `bias` is accepted for API parity
    but unused: train-mode BN mean subtraction cancels it exactly.
    """
    del bias
    N, Cin, H, W = x_nchw.shape
    KH, KW, _, Cout = w_khkwcico.shape
    assert (KH, KW) == (3, 3)
    HW = H * W
    FLAT = (H + 2) * W + 2

    # Fused-in-VMEM path: whole conv intermediate must fit scratch.
    conv_sc_bytes = N * Cout * HW * 4
    assert conv_sc_bytes <= 40 * 1024 * 1024, (
        "conv intermediate too large for the fused-in-VMEM path")
    # TODO(synk): add a two-pass spill path (bf16 conv intermediate in HBM)
    # plus a spatial grid axis for large N*H*W and v7x megacore parallelism.

    x = x_nchw.astype(jnp.float32)
    # Pad H only, flatten spatially, add one guard zero at each end.
    # Width-boundary handling is done with lane masks inside the kernel, so
    # there is no NHWC transpose and no lane-sparse Cin-minor block.
    xh = jnp.pad(x, ((0, 0), (0, 0), (1, 1), (0, 0)))            # (N,Cin,H+2,W)
    x_flat = jnp.pad(xh.reshape(N, Cin, (H + 2) * W),
                     ((0, 0), (0, 0), (1, 1)))                   # (N,Cin,FLAT)

    # (3,3,Cin,Cout) -> (9, Cout, Cin), tap index = 3*kh + kw.
    w_taps = jnp.transpose(w_khkwcico.astype(jnp.float32),
                           (0, 1, 3, 2)).reshape(9, Cout, Cin)
    gamma2 = gamma.astype(jnp.float32).reshape(Cout, 1)
    beta2 = beta.astype(jnp.float32).reshape(Cout, 1)

    kernel = functools.partial(fused_conv_bn_relu_kernel,
                               H=H, W=W, inv_count=1.0 / float(N * HW))

    out = pl.pallas_call(
        kernel,
        out_shape=jax.ShapeDtypeStruct((N, Cout, HW), jnp.float32),
        grid_spec=pltpu.PrefetchScalarGridSpec(
            num_scalar_prefetch=0,
            grid=(2, N),            # (phase, batch) -- both serial
            in_specs=[
                # Pin the input block to 0 during phase 1 (it is not read).
                pl.BlockSpec((None, Cin, FLAT),
                             lambda p, n: (n * (1 - p), 0, 0)),
                pl.BlockSpec((9, Cout, Cin), lambda p, n: (0, 0, 0)),
                pl.BlockSpec((Cout, 1), lambda p, n: (0, 0)),
                pl.BlockSpec((Cout, 1), lambda p, n: (0, 0)),
            ],
            # Pin the output block to 0 during phase 0 so nothing is written
            # back to HBM until phase 1 fills it with real values.
            out_specs=pl.BlockSpec((None, Cout, HW),
                                   lambda p, n: (n * p, 0, 0)),
            scratch_shapes=[
                pltpu.VMEM((N, Cout, HW), jnp.float32),   # conv intermediate
                pltpu.VMEM((Cout, 1), jnp.float32),       # sum
                pltpu.VMEM((Cout, 1), jnp.float32),       # sum of squares
                pltpu.VMEM((Cout, 1), jnp.float32),       # folded scale
                pltpu.VMEM((Cout, 1), jnp.float32),       # folded shift
            ]),
        compiler_params=pltpu.CompilerParams(
            dimension_semantics=("arbitrary", "arbitrary"),
            vmem_limit_bytes=48 * 1024 * 1024),
    )(x_flat, w_taps, gamma2, beta2)

    # (N, Cout, H*W) is already NCHW element order: reshape is free.
    return out.reshape(N, Cout, H, W)


# ----------------------------------------------------------------------------
# Pure-JAX reference (same math as the PyTorch module), for validation.
# ----------------------------------------------------------------------------
def reference_forward(x_nchw, w_khkwcico, bias, gamma, beta):
    w_oihw = jnp.transpose(w_khkwcico, (3, 2, 0, 1))   # (Cout, Cin, KH, KW)
    conv = lax.conv_general_dilated(
        x_nchw, w_oihw, window_strides=(1, 1), padding=((1, 1), (1, 1)),
        dimension_numbers=("NCHW", "OIHW", "NCHW"),
        precision=lax.Precision.HIGHEST,
    ) + bias.reshape(1, -1, 1, 1)
    mean = jnp.mean(conv, axis=(0, 2, 3), keepdims=True)
    var = jnp.mean((conv - mean) ** 2, axis=(0, 2, 3), keepdims=True)
    y = (conv - mean) * lax.rsqrt(var + 1e-5)
    y = y * gamma.reshape(1, -1, 1, 1) + beta.reshape(1, -1, 1, 1)
    return jnp.maximum(y, 0.0)


if __name__ == "__main__":
    # Small shapes consistent with the module: NCHW input.
    N, Cin, H, W = 2, 4, 16, 16
    Cout = 8

    key = jax.random.PRNGKey(0)
    kx, kwgt, kb = jax.random.split(key, 3)

    x = jax.random.normal(kx, (N, Cin, H, W), dtype=jnp.float32)

    # Deterministic parameter init (shapes match nn.Conv2d / nn.BatchNorm2d).
    fan_in = Cin * 3 * 3
    bound = 1.0 / (fan_in ** 0.5)
    w = jax.random.uniform(kwgt, (3, 3, Cin, Cout), jnp.float32, -bound, bound)
    b = jax.random.uniform(kb, (Cout,), jnp.float32, -bound, bound)
    gamma = jnp.ones((Cout,), jnp.float32)      # BN weight init = 1
    beta = jnp.zeros((Cout,), jnp.float32)      # BN bias init = 0

    out = jax.block_until_ready(conv_block_forward(x, w, b, gamma, beta))
    ref = jax.block_until_ready(reference_forward(x, w, b, gamma, beta))

    assert out.shape == (N, Cout, H, W)
    assert jnp.allclose(out, ref, rtol=1e-2, atol=1e-2), "mismatch vs reference"

    print("KERNEL_OK")
</pallas_src>

<mosaic_0001>
module attributes {stable_mosaic.version = 11 : i64} {
  func.func @fused_conv_bn_relu_kernel(%arg0: i32, %arg1: i32, %arg2: memref<1x4x290xf32, #tpu.memory_space<vmem>>, %arg3: memref<9x8x4xf32, #tpu.memory_space<vmem>>, %arg4: memref<8x1xf32, #tpu.memory_space<vmem>>, %arg5: memref<8x1xf32, #tpu.memory_space<vmem>>, %arg6: memref<1x8x256xf32, #tpu.memory_space<vmem>>, %arg7: memref<2x8x256xf32, #tpu.memory_space<vmem>>, %arg8: memref<8x1xf32, #tpu.memory_space<vmem>>, %arg9: memref<8x1xf32, #tpu.memory_space<vmem>>, %arg10: memref<8x1xf32, #tpu.memory_space<vmem>>, %arg11: memref<8x1xf32, #tpu.memory_space<vmem>>) attributes {dimension_semantics = [#tpu.dimension_semantics<arbitrary>, #tpu.dimension_semantics<arbitrary>], iteration_bounds = array<i64: 2, 2>, scalar_prefetch = 0 : i64, scratch_operands = 5 : i64, tpu.core_type = #tpu.core_type<tc>, window_params = [{transform_indices = @transform_0, window_bounds = array<i64: 1, 4, 290>}, {pipeline_mode = #tpu.pipeline_mode<synchronous>, transform_indices = @transform_1, window_bounds = array<i64: 9, 8, 4>}, {pipeline_mode = #tpu.pipeline_mode<synchronous>, transform_indices = @transform_2, window_bounds = array<i64: 8, 1>}, {pipeline_mode = #tpu.pipeline_mode<synchronous>, transform_indices = @transform_3, window_bounds = array<i64: 8, 1>}, {transform_indices = @transform_4, window_bounds = array<i64: 1, 8, 256>}]} {
    %c0_i32 = arith.constant 0 : i32
    %0 = arith.cmpi eq, %arg0, %c0_i32 : i32
    %1 = arith.extui %0 : i1 to i32
    %c0_i32_0 = arith.constant 0 : i32
    %2 = arith.cmpi ne, %1, %c0_i32_0 : i32
    scf.if %2 {
      %c0_i32_2 = arith.constant 0 : i32
      %6 = arith.cmpi eq, %arg1, %c0_i32_2 : i32
      %7 = arith.extui %6 : i1 to i32
      %c0_i32_3 = arith.constant 0 : i32
      %8 = arith.cmpi ne, %7, %c0_i32_3 : i32
      scf.if %8 {
        %cst_76 = arith.constant 0.000000e+00 : f32
        %124 = vector.broadcast %cst_76 : f32 to vector<8x1xf32>
        %c0_77 = arith.constant 0 : index
        %c0_78 = arith.constant 0 : index
        %125 = vector.load %arg8[%c0_77, %c0_78] : memref<8x1xf32, #tpu.memory_space<vmem>>, vector<8x1xf32>
        tpu.vector_store %arg8[%c0_77, %c0_78], %124 {strides = array<i32>} : memref<8x1xf32, #tpu.memory_space<vmem>>, vector<8x1xf32>,
        %cst_79 = arith.constant 0.000000e+00 : f32
        %126 = vector.broadcast %cst_79 : f32 to vector<8x1xf32>
        %c0_80 = arith.constant 0 : index
        %c0_81 = arith.constant 0 : index
        %127 = vector.load %arg9[%c0_80, %c0_81] : memref<8x1xf32, #tpu.memory_space<vmem>>, vector<8x1xf32>
        tpu.vector_store %arg9[%c0_80, %c0_81], %126 {strides = array<i32>} : memref<8x1xf32, #tpu.memory_space<vmem>>, vector<8x1xf32>,
      } else {
      }
      %9 = tpu.iota {dimensions = array<i32: 1>} : vector<1x256xi32>
      %c16_i32 = arith.constant 16 : i32
      %c0_i32_4 = arith.constant 0 : i32
      %10 = arith.cmpi eq, %c16_i32, %c0_i32_4 : i32
      %c1_i32_5 = arith.constant 1 : i32
      %11 = arith.select %10, %c1_i32_5, %c16_i32 : i32
      %12 = vector.broadcast %11 : i32 to vector<1x256xi32>
      %13 = arith.remsi %9, %12 : vector<1x256xi32>
      %c0_i32_6 = arith.constant 0 : i32
      %14 = vector.broadcast %c0_i32_6 : i32 to vector<1x256xi32>
      %15 = arith.cmpi ne, %13, %14 : vector<1x256xi32>
      %c0_i32_7 = arith.constant 0 : i32
      %16 = vector.broadcast %c0_i32_7 : i32 to vector<1x256xi32>
      %17 = arith.cmpi slt, %13, %16 : vector<1x256xi32>
      %c0_i32_8 = arith.constant 0 : i32
      %18 = arith.cmpi slt, %11, %c0_i32_8 : i32
      %19 = vector.broadcast %18 : i1 to vector<1x256xi1>
      %20 = vector.broadcast %19 : vector<1x256xi1> to vector<1x256xi1>
      %21 = arith.xori %17, %20 : vector<1x256xi1>
      %22 = arith.andi %21, %15 : vector<1x256xi1>
      %23 = vector.broadcast %11 : i32 to vector<1x256xi32>
      %24 = arith.addi %13, %23 : vector<1x256xi32>
      %25 = arith.select %22, %24, %13 : vector<1x256xi1>, vector<1x256xi32>
      %c0_i32_9 = arith.constant 0 : i32
      %26 = vector.broadcast %c0_i32_9 : i32 to vector<1x256xi32>
      %27 = arith.cmpi sgt, %25, %26 : vector<1x256xi32>
      %c15_i32 = arith.constant 15 : i32
      %28 = vector.broadcast %c15_i32 : i32 to vector<1x256xi32>
      %29 = arith.cmpi slt, %25, %28 : vector<1x256xi32>
      %cst = arith.constant 0.000000e+00 : f32
      %30 = vector.broadcast %cst : f32 to vector<8x256xf32>
      %c0 = arith.constant 0 : index
      %c0_10 = arith.constant 0 : index
      %c0_11 = arith.constant 0 : index
      %31 = vector.load %arg2[%c0, %c0_10, %c0_11] : memref<1x4x290xf32, #tpu.memory_space<vmem>>, vector<1x4x256xf32>
      %32 = vector.shape_cast %31 : vector<1x4x256xf32> to vector<4x256xf32>
      %cst_12 = arith.constant 0.000000e+00 : f32
      %33 = vector.shape_cast %27 : vector<1x256xi1> to vector<1x256xi1>
      %34 = vector.broadcast %33 : vector<1x256xi1> to vector<4x256xi1>
      %35 = vector.broadcast %cst_12 : f32 to vector<4x256xf32>
      %36 = arith.select %34, %32, %35 : vector<4x256xi1>, vector<4x256xf32>
      %c0_13 = arith.constant 0 : index
      %c0_14 = arith.constant 0 : index
      %c0_15 = arith.constant 0 : index
      %37 = vector.load %arg3[%c0_13, %c0_14, %c0_15] : memref<9x8x4xf32, #tpu.memory_space<vmem>>, vector<1x8x4xf32>
      %38 = vector.shape_cast %37 : vector<1x8x4xf32> to vector<8x4xf32>
      %cst_16 = arith.constant dense<0.000000e+00> : vector<8x256xf32>
      %39 = tpu.matmul %38, %36, %cst_16 {dimension_numbers = #tpu.dot_dimension_numbers<[1], [0], [0], [1], [0, 0, 1, 1], [], []>} : vector<8x4xf32>, vector<4x256xf32>, vector<8x256xf32> -> vector<8x256xf32>
      %40 = arith.addf %30, %39 : vector<8x256xf32>
      %c0_17 = arith.constant 0 : index
      %c0_18 = arith.constant 0 : index
      %c1 = arith.constant 1 : index
      %41 = vector.load %arg2[%c0_17, %c0_18, %c1] : memref<1x4x290xf32, #tpu.memory_space<vmem>>, vector<1x4x256xf32>
      %42 = vector.shape_cast %41 : vector<1x4x256xf32> to vector<4x256xf32>
      %c1_19 = arith.constant 1 : index
      %c0_20 = arith.constant 0 : index
      %c0_21 = arith.constant 0 : index
      %43 = vector.load %arg3[%c1_19, %c0_20, %c0_21] : memref<9x8x4xf32, #tpu.memory_space<vmem>>, vector<1x8x4xf32>
      %44 = vector.shape_cast %43 : vector<1x8x4xf32> to vector<8x4xf32>
      %cst_22 = arith.constant dense<0.000000e+00> : vector<8x256xf32>
      %45 = tpu.matmul %44, %42, %cst_22 {dimension_numbers = #tpu.dot_dimension_numbers<[1], [0], [0], [1], [0, 0, 1, 1], [], []>} : vector<8x4xf32>, vector<4x256xf32>, vector<8x256xf32> -> vector<8x256xf32>
      %46 = arith.addf %40, %45 : vector<8x256xf32>
      %c0_23 = arith.constant 0 : index
      %c0_24 = arith.constant 0 : index
      %c2 = arith.constant 2 : index
      %47 = vector.load %arg2[%c0_23, %c0_24, %c2] : memref<1x4x290xf32, #tpu.memory_space<vmem>>, vector<1x4x256xf32>
      %48 = vector.shape_cast %47 : vector<1x4x256xf32> to vector<4x256xf32>
      %cst_25 = arith.constant 0.000000e+00 : f32
      %49 = vector.shape_cast %29 : vector<1x256xi1> to vector<1x256xi1>
      %50 = vector.broadcast %49 : vector<1x256xi1> to vector<4x256xi1>
      %51 = vector.broadcast %cst_25 : f32 to vector<4x256xf32>
      %52 = arith.select %50, %48, %51 : vector<4x256xi1>, vector<4x256xf32>
      %c2_26 = arith.constant 2 : index
      %c0_27 = arith.constant 0 : index
      %c0_28 = arith.constant 0 : index
      %53 = vector.load %arg3[%c2_26, %c0_27, %c0_28] : memref<9x8x4xf32, #tpu.memory_space<vmem>>, vector<1x8x4xf32>
      %54 = vector.shape_cast %53 : vector<1x8x4xf32> to vector<8x4xf32>
      %cst_29 = arith.constant dense<0.000000e+00> : vector<8x256xf32>
      %55 = tpu.matmul %54, %52, %cst_29 {dimension_numbers = #tpu.dot_dimension_numbers<[1], [0], [0], [1], [0, 0, 1, 1], [], []>} : vector<8x4xf32>, vector<4x256xf32>, vector<8x256xf32> -> vector<8x256xf32>
      %56 = arith.addf %46, %55 : vector<8x256xf32>
      %c0_30 = arith.constant 0 : index
      %c0_31 = arith.constant 0 : index
      %c16 = arith.constant 16 : index
      %57 = vector.load %arg2[%c0_30, %c0_31, %c16] : memref<1x4x290xf32, #tpu.memory_space<vmem>>, vector<1x4x256xf32>
      %58 = vector.shape_cast %57 : vector<1x4x256xf32> to vector<4x256xf32>
      %cst_32 = arith.constant 0.000000e+00 : f32
      %59 = vector.shape_cast %27 : vector<1x256xi1> to vector<1x256xi1>
      %60 = vector.broadcast %59 : vector<1x256xi1> to vector<4x256xi1>
      %61 = vector.broadcast %cst_32 : f32 to vector<4x256xf32>
      %62 = arith.select %60, %58, %61 : vector<4x256xi1>, vector<4x256xf32>
      %c3 = arith.constant 3 : index
      %c0_33 = arith.constant 0 : index
      %c0_34 = arith.constant 0 : index
      %63 = vector.load %arg3[%c3, %c0_33, %c0_34] : memref<9x8x4xf32, #tpu.memory_space<vmem>>, vector<1x8x4xf32>
      %64 = vector.shape_cast %63 : vector<1x8x4xf32> to vector<8x4xf32>
      %cst_35 = arith.constant dense<0.000000e+00> : vector<8x256xf32>
      %65 = tpu.matmul %64, %62, %cst_35 {dimension_numbers = #tpu.dot_dimension_numbers<[1], [0], [0], [1], [0, 0, 1, 1], [], []>} : vector<8x4xf32>, vector<4x256xf32>, vector<8x256xf32> -> vector<8x256xf32>
      %66 = arith.addf %56, %65 : vector<8x256xf32>
      %c0_36 = arith.constant 0 : index
      %c0_37 = arith.constant 0 : index
      %c17 = arith.constant 17 : index
      %67 = vector.load %arg2[%c0_36, %c0_37, %c17] : memref<1x4x290xf32, #tpu.memory_space<vmem>>, vector<1x4x256xf32>
      %68 = vector.shape_cast %67 : vector<1x4x256xf32> to vector<4x256xf32>
      %c4 = arith.constant 4 : index
      %c0_38 = arith.constant 0 : index
      %c0_39 = arith.constant 0 : index
      %69 = vector.load %arg3[%c4, %c0_38, %c0_39] : memref<9x8x4xf32, #tpu.memory_space<vmem>>, vector<1x8x4xf32>
      %70 = vector.shape_cast %69 : vector<1x8x4xf32> to vector<8x4xf32>
      %cst_40 = arith.constant dense<0.000000e+00> : vector<8x256xf32>
      %71 = tpu.matmul %70, %68, %cst_40 {dimension_numbers = #tpu.dot_dimension_numbers<[1], [0], [0], [1], [0, 0, 1, 1], [], []>} : vector<8x4xf32>, vector<4x256xf32>, vector<8x256xf32> -> vector<8x256xf32>
      %72 = arith.addf %66, %71 : vector<8x256xf32>
      %c0_41 = arith.constant 0 : index
      %c0_42 = arith.constant 0 : index
      %c18 = arith.constant 18 : index
      %73 = vector.load %arg2[%c0_41, %c0_42, %c18] : memref<1x4x290xf32, #tpu.memory_space<vmem>>, vector<1x4x256xf32>
      %74 = vector.shape_cast %73 : vector<1x4x256xf32> to vector<4x256xf32>
      %cst_43 = arith.constant 0.000000e+00 : f32
      %75 = vector.shape_cast %29 : vector<1x256xi1> to vector<1x256xi1>
      %76 = vector.broadcast %75 : vector<1x256xi1> to vector<4x256xi1>
      %77 = vector.broadcast %cst_43 : f32 to vector<4x256xf32>
      %78 = arith.select %76, %74, %77 : vector<4x256xi1>, vector<4x256xf32>
      %c5 = arith.constant 5 : index
      %c0_44 = arith.constant 0 : index
      %c0_45 = arith.constant 0 : index
      %79 = vector.load %arg3[%c5, %c0_44, %c0_45] : memref<9x8x4xf32, #tpu.memory_space<vmem>>, vector<1x8x4xf32>
      %80 = vector.shape_cast %79 : vector<1x8x4xf32> to vector<8x4xf32>
      %cst_46 = arith.constant dense<0.000000e+00> : vector<8x256xf32>
      %81 = tpu.matmul %80, %78, %cst_46 {dimension_numbers = #tpu.dot_dimension_numbers<[1], [0], [0], [1], [0, 0, 1, 1], [], []>} : vector<8x4xf32>, vector<4x256xf32>, vector<8x256xf32> -> vector<8x256xf32>
      %82 = arith.addf %72, %81 : vector<8x256xf32>
      %c0_47 = arith.constant 0 : index
      %c0_48 = arith.constant 0 : index
      %c32 = arith.constant 32 : index
      %83 = vector.load %arg2[%c0_47, %c0_48, %c32] : memref<1x4x290xf32, #tpu.memory_space<vmem>>, vector<1x4x256xf32>
      %84 = vector.shape_cast %83 : vector<1x4x256xf32> to vector<4x256xf32>
      %cst_49 = arith.constant 0.000000e+00 : f32
      %85 = vector.shape_cast %27 : vector<1x256xi1> to vector<1x256xi1>
      %86 = vector.broadcast %85 : vector<1x256xi1> to vector<4x256xi1>
      %87 = vector.broadcast %cst_49 : f32 to vector<4x256xf32>
      %88 = arith.select %86, %84, %87 : vector<4x256xi1>, vector<4x256xf32>
      %c6 = arith.constant 6 : index
      %c0_50 = arith.constant 0 : index
      %c0_51 = arith.constant 0 : index
      %89 = vector.load %arg3[%c6, %c0_50, %c0_51] : memref<9x8x4xf32, #tpu.memory_space<vmem>>, vector<1x8x4xf32>
      %90 = vector.shape_cast %89 : vector<1x8x4xf32> to vector<8x4xf32>
      %cst_52 = arith.constant dense<0.000000e+00> : vector<8x256xf32>
      %91 = tpu.matmul %90, %88, %cst_52 {dimension_numbers = #tpu.dot_dimension_numbers<[1], [0], [0], [1], [0, 0, 1, 1], [], []>} : vector<8x4xf32>, vector<4x256xf32>, vector<8x256xf32> -> vector<8x256xf32>
      %92 = arith.addf %82, %91 : vector<8x256xf32>
      %c0_53 = arith.constant 0 : index
      %c0_54 = arith.constant 0 : index
      %c33 = arith.constant 33 : index
      %93 = vector.load %arg2[%c0_53, %c0_54, %c33] : memref<1x4x290xf32, #tpu.memory_space<vmem>>, vector<1x4x256xf32>
      %94 = vector.shape_cast %93 : vector<1x4x256xf32> to vector<4x256xf32>
      %c7 = arith.constant 7 : index
      %c0_55 = arith.constant 0 : index
      %c0_56 = arith.constant 0 : index
      %95 = vector.load %arg3[%c7, %c0_55, %c0_56] : memref<9x8x4xf32, #tpu.memory_space<vmem>>, vector<1x8x4xf32>
      %96 = vector.shape_cast %95 : vector<1x8x4xf32> to vector<8x4xf32>
      %cst_57 = arith.constant dense<0.000000e+00> : vector<8x256xf32>
      %97 = tpu.matmul %96, %94, %cst_57 {dimension_numbers = #tpu.dot_dimension_numbers<[1], [0], [0], [1], [0, 0, 1, 1], [], []>} : vector<8x4xf32>, vector<4x256xf32>, vector<8x256xf32> -> vector<8x256xf32>
      %98 = arith.addf %92, %97 : vector<8x256xf32>
      %c0_58 = arith.constant 0 : index
      %c0_59 = arith.constant 0 : index
      %c34 = arith.constant 34 : index
      %99 = vector.load %arg2[%c0_58, %c0_59, %c34] : memref<1x4x290xf32, #tpu.memory_space<vmem>>, vector<1x4x256xf32>
      %100 = vector.shape_cast %99 : vector<1x4x256xf32> to vector<4x256xf32>
      %cst_60 = arith.constant 0.000000e+00 : f32
      %101 = vector.shape_cast %29 : vector<1x256xi1> to vector<1x256xi1>
      %102 = vector.broadcast %101 : vector<1x256xi1> to vector<4x256xi1>
      %103 = vector.broadcast %cst_60 : f32 to vector<4x256xf32>
      %104 = arith.select %102, %100, %103 : vector<4x256xi1>, vector<4x256xf32>
      %c8 = arith.constant 8 : index
      %c0_61 = arith.constant 0 : index
      %c0_62 = arith.constant 0 : index
      %105 = vector.load %arg3[%c8, %c0_61, %c0_62] : memref<9x8x4xf32, #tpu.memory_space<vmem>>, vector<1x8x4xf32>
      %106 = vector.shape_cast %105 : vector<1x8x4xf32> to vector<8x4xf32>
      %cst_63 = arith.constant dense<0.000000e+00> : vector<8x256xf32>
      %107 = tpu.matmul %106, %104, %cst_63 {dimension_numbers = #tpu.dot_dimension_numbers<[1], [0], [0], [1], [0, 0, 1, 1], [], []>} : vector<8x4xf32>, vector<4x256xf32>, vector<8x256xf32> -> vector<8x256xf32>
      %108 = arith.addf %98, %107 : vector<8x256xf32>
      %109 = arith.index_cast %arg1 : i32 to index
      %c0_64 = arith.constant 0 : index
      %c0_65 = arith.constant 0 : index
      %110 = vector.load %arg7[%109, %c0_64, %c0_65] : memref<2x8x256xf32, #tpu.memory_space<vmem>>, vector<1x8x256xf32>
      %111 = vector.shape_cast %110 : vector<1x8x256xf32> to vector<8x256xf32>
      %112 = vector.shape_cast %108 : vector<8x256xf32> to vector<1x8x256xf32>
      tpu.vector_store %arg7[%109, %c0_64, %c0_65], %112 {strides = array<i32>} : memref<2x8x256xf32, #tpu.memory_space<vmem>>, vector<1x8x256xf32>,
      %c0_66 = arith.constant 0 : index
      %c0_67 = arith.constant 0 : index
      %113 = vector.load %arg8[%c0_66, %c0_67] : memref<8x1xf32, #tpu.memory_space<vmem>>, vector<8x1xf32>
      %cst_68 = arith.constant dense<0.000000e+00> : vector<8xf32>
      %114 = vector.multi_reduction <add>, %108, %cst_68 [1] : vector<8x256xf32> to vector<8xf32>
      %115 = vector.shape_cast %114 : vector<8xf32> to vector<8x1xf32>
      %116 = arith.addf %113, %115 : vector<8x1xf32>
      %c0_69 = arith.constant 0 : index
      %c0_70 = arith.constant 0 : index
      %117 = vector.load %arg8[%c0_69, %c0_70] : memref<8x1xf32, #tpu.memory_space<vmem>>, vector<8x1xf32>
      tpu.vector_store %arg8[%c0_69, %c0_70], %116 {strides = array<i32>} : memref<8x1xf32, #tpu.memory_space<vmem>>, vector<8x1xf32>,
      %c0_71 = arith.constant 0 : index
      %c0_72 = arith.constant 0 : index
      %118 = vector.load %arg9[%c0_71, %c0_72] : memref<8x1xf32, #tpu.memory_space<vmem>>, vector<8x1xf32>
      %119 = arith.mulf %108, %108 : vector<8x256xf32>
      %cst_73 = arith.constant dense<0.000000e+00> : vector<8xf32>
      %120 = vector.multi_reduction <add>, %119, %cst_73 [1] : vector<8x256xf32> to vector<8xf32>
      %121 = vector.shape_cast %120 : vector<8xf32> to vector<8x1xf32>
      %122 = arith.addf %118, %121 : vector<8x1xf32>
      %c0_74 = arith.constant 0 : index
      %c0_75 = arith.constant 0 : index
      %123 = vector.load %arg9[%c0_74, %c0_75] : memref<8x1xf32, #tpu.memory_space<vmem>>, vector<8x1xf32>
      tpu.vector_store %arg9[%c0_74, %c0_75], %122 {strides = array<i32>} : memref<8x1xf32, #tpu.memory_space<vmem>>, vector<8x1xf32>,
    } else {
    }
    %c1_i32 = arith.constant 1 : i32
    %3 = arith.cmpi eq, %arg0, %c1_i32 : i32
    %4 = arith.extui %3 : i1 to i32
    %c0_i32_1 = arith.constant 0 : i32
    %5 = arith.cmpi ne, %4, %c0_i32_1 : i32
    scf.if %5 {
      %c0_i32_2 = arith.constant 0 : i32
      %6 = arith.cmpi eq, %arg1, %c0_i32_2 : i32
      %7 = arith.extui %6 : i1 to i32
      %c0_i32_3 = arith.constant 0 : i32
      %8 = arith.cmpi ne, %7, %c0_i32_3 : i32
      scf.if %8 {
        %c0_12 = arith.constant 0 : index
        %c0_13 = arith.constant 0 : index
        %23 = vector.load %arg8[%c0_12, %c0_13] : memref<8x1xf32, #tpu.memory_space<vmem>>, vector<8x1xf32>
        %cst_14 = arith.constant 0.001953125 : f32
        %24 = vector.broadcast %cst_14 : f32 to vector<8x1xf32>
        %25 = arith.mulf %23, %24 : vector<8x1xf32>
        %c0_15 = arith.constant 0 : index
        %c0_16 = arith.constant 0 : index
        %26 = vector.load %arg9[%c0_15, %c0_16] : memref<8x1xf32, #tpu.memory_space<vmem>>, vector<8x1xf32>
        %cst_17 = arith.constant 0.001953125 : f32
        %27 = vector.broadcast %cst_17 : f32 to vector<8x1xf32>
        %28 = arith.mulf %26, %27 : vector<8x1xf32>
        %29 = arith.mulf %25, %25 : vector<8x1xf32>
        %30 = arith.subf %28, %29 : vector<8x1xf32>
        %cst_18 = arith.constant 0.000000e+00 : f32
        %31 = vector.broadcast %cst_18 : f32 to vector<8x1xf32>
        %32 = arith.maximumf %30, %31 : vector<8x1xf32>
        %c0_19 = arith.constant 0 : index
        %c0_20 = arith.constant 0 : index
        %33 = vector.load %arg4[%c0_19, %c0_20] : memref<8x1xf32, #tpu.memory_space<vmem>>, vector<8x1xf32>
        %cst_21 = arith.constant 9.99999974E-6 : f32
        %34 = vector.broadcast %cst_21 : f32 to vector<8x1xf32>
        %35 = arith.addf %32, %34 : vector<8x1xf32>
        %36 = math.rsqrt %35 : vector<8x1xf32>
        %37 = arith.mulf %33, %36 : vector<8x1xf32>
        %c0_22 = arith.constant 0 : index
        %c0_23 = arith.constant 0 : index
        %38 = vector.load %arg10[%c0_22, %c0_23] : memref<8x1xf32, #tpu.memory_space<vmem>>, vector<8x1xf32>
        tpu.vector_store %arg10[%c0_22, %c0_23], %37 {strides = array<i32>} : memref<8x1xf32, #tpu.memory_space<vmem>>, vector<8x1xf32>,
        %c0_24 = arith.constant 0 : index
        %c0_25 = arith.constant 0 : index
        %39 = vector.load %arg5[%c0_24, %c0_25] : memref<8x1xf32, #tpu.memory_space<vmem>>, vector<8x1xf32>
        %40 = arith.mulf %25, %37 : vector<8x1xf32>
        %41 = arith.subf %39, %40 : vector<8x1xf32>
        %c0_26 = arith.constant 0 : index
        %c0_27 = arith.constant 0 : index
        %42 = vector.load %arg11[%c0_26, %c0_27] : memref<8x1xf32, #tpu.memory_space<vmem>>, vector<8x1xf32>
        tpu.vector_store %arg11[%c0_26, %c0_27], %41 {strides = array<i32>} : memref<8x1xf32, #tpu.memory_space<vmem>>, vector<8x1xf32>,
      } else {
      }
      %9 = arith.index_cast %arg1 : i32 to index
      %c0 = arith.constant 0 : index
      %c0_4 = arith.constant 0 : index
      %10 = vector.load %arg7[%9, %c0, %c0_4] : memref<2x8x256xf32, #tpu.memory_space<vmem>>, vector<1x8x256xf32>
      %11 = vector.shape_cast %10 : vector<1x8x256xf32> to vector<8x256xf32>
      %c0_5 = arith.constant 0 : index
      %c0_6 = arith.constant 0 : index
      %12 = vector.load %arg10[%c0_5, %c0_6] : memref<8x1xf32, #tpu.memory_space<vmem>>, vector<8x1xf32>
      %13 = vector.broadcast %12 : vector<8x1xf32> to vector<8x256xf32>
      %14 = arith.mulf %11, %13 : vector<8x256xf32>
      %c0_7 = arith.constant 0 : index
      %c0_8 = arith.constant 0 : index
      %15 = vector.load %arg11[%c0_7, %c0_8] : memref<8x1xf32, #tpu.memory_space<vmem>>, vector<8x1xf32>
      %16 = vector.broadcast %15 : vector<8x1xf32> to vector<8x256xf32>
      %17 = arith.addf %14, %16 : vector<8x256xf32>
      %cst = arith.constant 0.000000e+00 : f32
      %18 = vector.broadcast %cst : f32 to vector<8x256xf32>
      %19 = arith.maximumf %17, %18 : vector<8x256xf32>
      %c0_9 = arith.constant 0 : index
      %c0_10 = arith.constant 0 : index
      %c0_11 = arith.constant 0 : index
      %20 = vector.load %arg6[%c0_9, %c0_10, %c0_11] : memref<1x8x256xf32, #tpu.memory_space<vmem>>, vector<1x8x256xf32>
      %21 = vector.shape_cast %20 : vector<1x8x256xf32> to vector<8x256xf32>
      %22 = vector.shape_cast %19 : vector<8x256xf32> to vector<1x8x256xf32>
      tpu.vector_store %arg6[%c0_9, %c0_10, %c0_11], %22 {strides = array<i32>} : memref<1x8x256xf32, #tpu.memory_space<vmem>>, vector<1x8x256xf32>,
    } else {
    }
    return
  }
  func.func @transform_0(%arg0: i32, %arg1: i32) -> (i32, i32, i32) {
    %c1_i32 = arith.constant 1 : i32
    %0 = arith.subi %c1_i32, %arg0 : i32
    %1 = arith.muli %arg1, %0 : i32
    %c0_i32 = arith.constant 0 : i32
    %c0_i32_0 = arith.constant 0 : i32
    %c0_i32_1 = arith.constant 0 : i32
    return %1, %c0_i32, %c0_i32_0 : i32, i32, i32
  }
  func.func @transform_1(%arg0: i32, %arg1: i32) -> (i32, i32, i32) {
    %c0_i32 = arith.constant 0 : i32
    %c0_i32_0 = arith.constant 0 : i32
    %c0_i32_1 = arith.constant 0 : i32
    %c0_i32_2 = arith.constant 0 : i32
    return %c0_i32, %c0_i32_0, %c0_i32_1 : i32, i32, i32
  }
  func.func @transform_2(%arg0: i32, %arg1: i32) -> (i32, i32) {
    %c0_i32 = arith.constant 0 : i32
    %c0_i32_0 = arith.constant 0 : i32
    %c0_i32_1 = arith.constant 0 : i32
    return %c0_i32, %c0_i32_0 : i32, i32
  }
  func.func @transform_3(%arg0: i32, %arg1: i32) -> (i32, i32) {
    %c0_i32 = arith.constant 0 : i32
    %c0_i32_0 = arith.constant 0 : i32
    %c0_i32_1 = arith.constant 0 : i32
    return %c0_i32, %c0_i32_0 : i32, i32
  }
  func.func @transform_4(%arg0: i32, %arg1: i32) -> (i32, i32, i32) {
    %0 = arith.muli %arg1, %arg0 : i32
    %c0_i32 = arith.constant 0 : i32
    %c0_i32_0 = arith.constant 0 : i32
    %c0_i32_1 = arith.constant 0 : i32
    return %0, %c0_i32, %c0_i32_0 : i32, i32, i32
  }
}

</mosaic_0001>

<bundles_post_ra>
// kernel: conv_block_forward.1
= control target key start
LH: loop header
LB: loop body
LE: loop exit
PB: predicated region body
PF: predicated region fallthrough
CT: control target
= control target key end

     0   :  { %s1275_s15 = smov 0   ;;  %s1277_s16 = smov 0   ;;  %s1481_s0 = inlined_call_operand.vmem [shape: f32[2,4,290], index: 0, kind: input, shape index: {}]   ;;  %s1482_s1 = inlined_call_operand.vmem [shape: f32[9,8,4], index: 1, kind: input, shape index: {}]   ;;  %s1483_s2 = inlined_call_operand.vmem [shape: f32[8,1], index: 2, kind: input, shape index: {}]   ;;  %s1484_s3 = inlined_call_operand.vmem [shape: f32[8,1], index: 3, kind: input, shape index: {}]   ;;  %s1485_s4 = inlined_call_operand.vmem [shape: f32[2,8,256], index: 4, kind: output, shape index: {}]  }
   0x1   :  { %s1279_s17 = smov 0   ;;  %s1281_s18 = smov 0  }
   0x2   :  { %s1283_s19 = smov 0  }
   0x3 LB: > { %s23_s20 = sadd.s32 1, %s1230_s17  ;;  %s26_s21 = sadd.s32 1, %s1234_s18  ;;  %s1238_s19 = sphi %s1283_s19, %s14_s19   ;;  %s1234_s18 = sphi %s1281_s18, %s1497_s18   ;;  %s1230_s17 = sphi %s1279_s17, %s1496_s17   ;;  %s1226_s16 = sphi %s1277_s16, %s1495_s16   ;;  %s1222_s15 = sphi %s1275_s15, %s1494_s15  }
   0x4   : > { %p24_p0 = scmp.ge.s32.totalorder %s23_s20, 2  ;;  %p1085_p1 = scmp.ge.s32.totalorder %s1238_s19, 1 }
   0x5   : > { %p184_p2 = scmp.lt.s32.totalorder %s1238_s19, 5 }
   0x6   : > { %s1499_s20 = smov (%p24_p0, %s23_s20), 0  ;;  %s1501_s21 = smov (!%p24_p0, %s26_s21), %s1234_s18 }
   0x7   : > { %p185_p3 = pnand %p1085_p1, %p184_p2  ;;  %p28_p4 = scmp.ge.s32.totalorder %s1501_s21, 2 }
   0x8   : > { %s213_s22 = ssub.s32 (!%p185_p3), 1, %s1226_s16  ;;  %s222_s23 = smul.u32 (!%p185_p3), %s1222_s15, %s1226_s16 }
   0x9   : > { %s1503_s21 = smov (%p28_p4, %s1501_s21), 0  ;;  %188 = sbr.rel (%p185_p3) target bundleno = 653 (0x28d), region = 36 }
   0xa   : > { %s214_s24 = smul.u32 (!%p185_p3), %s1222_s15, %s213_s22  ;;  %p223_p5 = scmp.lt.s32.totalorder (!%p185_p3), %s222_s23, 1 }
   0xb   : > { %p1089_p7 = scmp.ne.s32.totalorder (!%p185_p3), %s1226_s16, 0 }
   0xc   : > { %p215_p6 = scmp.lt.s32.totalorder (!%p185_p3), %s214_s24, 1 }
   0xe   : > { %s1505_s23 = smov (!%p223_p5, %s222_s23), 1  ;;  %s1507_s24 = smov (!%p215_p6, %s214_s24), 1 }
   0xf   : > { %s1143_s25 = sshll.u32 %s1505_s23, 4  ;;  %s1146_s26 = smul.u32 12, %s1507_s24 }
  0x10   : > { %s1316_s29 = scalar_lea.vmem %s1485_s4, %s1143_s25  ;;  %232 = sbr.rel (%p1089_p7) target bundleno = 473 (0x1d9), region = 40 }
  0x11   : > { %s1321_s6 = scalar_lea.vmem %s1481_s0, %s1146_s26  ;;  %p1090_p8 = scmp.ne.s32.totalorder (!%p1089_p7), %s1222_s15, 0 }
  0x15   : > { %236 = sbr.rel (%p1090_p8) target bundleno = 29 (0x1d), region = 44 }
  0x1a   : > { %vm237_vm0 = vcmask 7168   ;;  %v1240_v0 = vmov 0.0  }
  0x1b   : > { %238 = vst.msk [vmem:[#allocation3] sm:$0xff] %vm237_vm0, %v1240_v0 }
  0x1c   : > { %239 = vst.msk [vmem:[#allocation4] sm:$0xff] %vm237_vm0, %v1240_v0 }
  0x1d PF: > { %v286_v1 = vld [vmem:[%s1321_s6 + $0x8] sm:$0xf]  ;;  %v1327_v2 = vld [vmem:[%s1321_s6] sm:$0xff]  ;;  %s1241_s7 = smov 127   ;;  %s1242_s8 = smov 126   ;;  %v240_v36 = vlaneseq  ;;  %vm310_vm3 = vcmask 1043456  }
  0x1e   : > { %293 = vst [vmem:[#allocation1 + $0x10] ss:$2 sm:$0xff] %v286_v1  ;;  %v405_v3 = vld [vmem:[%s1321_s6 + $0x8] sm:$0xf]  ;;  %s1243_s9 = smov 112   ;;  %s1244_s10 = smov 111  }
  0x1f   : > { %277 = vst [vmem:[#allocation1] ss:$2 sm:$0xff] %v1327_v2  ;;  %v485_v10 = vld [vmem:[%s1321_s6 + $0x8] sm:$0xf]  ;;  %s1245_s11 = smov 110   ;;  %s1246_s12 = smov 96  }
  0x20   : > { %v561_v11 = vld [vmem:[%s1321_s6 + $0x8] sm:$0xf]  ;;  %s1247_s13 = smov 95   ;;  %s1248_s14 = smov 94   ;;  %v241_v37 = vand.u32 127, %v240_v36  ;;  %vm306_vm4 = vcmask 31744  }
  0x21   : > { %v631_v15 = vld [vmem:[%s1321_s6 + $0x8] sm:$0xf]  ;;  %v284_v46 = vld [vmem:[%s1482_s1] sm:$0xff]  ;;  %vm424_vm5 = vcmask 1031168   ;;  %vm303_vm6 = vcmask 1039360   ;;  %vm500_vm9 = vcmask 916480  }
  0x22   : > { %v707_v19 = vld [vmem:[%s1321_s6 + $0x8] sm:$0xf]  ;;  %v242_v38 = vadd.s32 128, %v241_v37  ;;  %v247_v39 = vand.u32 15, %v241_v37  ;;  %vm578_vm10 = vcmask 908288   ;;  %vm646_vm11 = vcmask 900096  }
  0x23   : > { %v783_v23 = vld [vmem:[%s1321_s6 + $0x8] sm:$0xf]  ;;  %vm722_vm12 = vcmask 785408   ;;  %vm800_vm13 = vcmask 777216   ;;  %vm868_vm14 = vcmask 769024   ;;  %s1144_s22 = sshll.u32 %s1222_s15, 4 }
  0x24   : > { %v853_v27 = vld [vmem:[%s1321_s6 + $0x8] sm:$0xf]  ;;  %v254_v40 = vand.u32 15, %v242_v38  ;;  %vm1349_vm1 = vcmp.gt.s32.totalorder %v247_v39, 0  ;;  %vm1370_vm7 = vcmp.lt.s32.totalorder %v247_v39, 15  ;;  %v1130_v39 = vld [vmem:[%s1482_s1 + $0x40] sm:$0xff] }
  0x25   : > { %v296_v4 = vld.sshfl [vmem:[#allocation1 + $0x10] sm:$0xff pattern:$0x75316420]  ;;  %v1091_v59 = vld [vmem:[%s1482_s1 + $0x8] sm:$0xff]  ;;  %s930_s23 = scalar_lea.vmem [#allocation2], %s1144_s22  ;;  %vm938_vm15 = vcmask 7168  }
  0x26   : > { %301 = vrot.lane.b32.xlu1 %v296_v4, %s1241_s7  ;;  %414 = vst [vmem:[#allocation1 + $0x10] ss:$2 sm:$0xff] %v405_v3  ;;  %v1331_v5 = vld.sshfl [vmem:[#allocation1] sm:$0xff pattern:$0x75316420]  ;;  %vm1353_vm2 = vcmp.gt.s32.totalorder %v254_v40, 0 }
  0x27   : > { %v1333_v6 = vld.sshfl [vmem:[#allocation1 + $0x8] sm:$0xff pattern:$0x75316420]  ;;  %v282_v43 = vsel %vm1349_vm1, %v1331_v5, 0.0  ;;  %vm1374_vm8 = vcmp.lt.s32.totalorder %v254_v40, 15  ;;  %v1100_v3 = vld [vmem:[%s1482_s1 + $0x10] sm:$0xff] }
  0x28   : > { %291 = vst [vmem:[#allocation1] ss:$2 sm:$0xff] %v1327_v2  ;;  %v283_v44 = vsel %vm1353_vm2, %v1333_v6, 0.0  ;;  %1096 = vmatpush.msk.msra.mxu2 %vm310_vm3, %v282_v43  ;;  %v1105_v6 = vld [vmem:[%s1482_s1 + $0x18] sm:$0xff] }
  0x29   : > { %1098 = vmatpush.msk.msra.mxu3 %vm310_vm3, %v283_v44  ;;  %1097 = vmatmul.msk.f32.vlgmr.msra.gmra.mxu2 %vm306_vm4, %v284_v46 }
  0x2a   : > { %1099 = vmatmul.msk.f32.vlgmr.msra.gmra.mxu3 %vm306_vm4, %v284_v46 }
  0x2d   : > { %v417_v7 = vld.sshfl [vmem:[#allocation1 + $0x10] sm:$0xff pattern:$0x75316420] }
  0x2e   : > { %422 = vrot.lane.b32.xlu2 %v417_v7, %s1242_s8  ;;  %490 = vst [vmem:[#allocation1 + $0x10] ss:$2 sm:$0xff] %v485_v10 }
  0x2f   : > { %v294_v8 = vld.sshfl [vmem:[#allocation1] sm:$0xff pattern:$0x75316420]  ;;  %v295_v9 = vld.sshfl [vmem:[#allocation1 + $0x8] sm:$0xff pattern:$0x75316420] }
  0x30   : > { %297 = vrot.lane.b32.xlu0 %v294_v8, %s1241_s7  ;;  %412 = vst [vmem:[#allocation1] ss:$2 sm:$0xff] %v1327_v2 }
  0x35   : > { %v493_v14 = vld.sshfl [vmem:[#allocation1 + $0x10] sm:$0xff pattern:$0x75316420] }
  0x36   : > { %568 = vst [vmem:[#allocation1 + $0x10] ss:$2 sm:$0xff] %v561_v11 }
  0x37   : > { %v415_v12 = vld.sshfl [vmem:[#allocation1] sm:$0xff pattern:$0x75316420]  ;;  %v416_v13 = vld.sshfl [vmem:[#allocation1 + $0x8] sm:$0xff pattern:$0x75316420] }
  0x38   : > { %299 = vrot.lane.b32.xlu0 %v295_v9, %s1241_s7  ;;  %418 = vrot.lane.b32.xlu1 %v415_v12, %s1242_s8  ;;  %488 = vst [vmem:[#allocation1] ss:$2 sm:$0xff] %v1327_v2  ;;  %v1110_v12 = vld [vmem:[%s1482_s1 + $0x20] sm:$0xff] }
  0x39   : > { %420 = vrot.lane.b32.xlu2 %v416_v13, %s1242_s8 }
  0x3d   : > { %v571_v18 = vld.sshfl [vmem:[#allocation1 + $0x10] sm:$0xff pattern:$0x75316420] }
  0x3e   : > { %636 = vst [vmem:[#allocation1 + $0x10] ss:$2 sm:$0xff] %v631_v15 }
  0x3f   : > { %v492_v16 = vld.sshfl [vmem:[#allocation1 + $0x8] sm:$0xff pattern:$0x75316420]  ;;  %v491_v17 = vld.sshfl [vmem:[#allocation1] sm:$0xff pattern:$0x75316420] }
  0x40   : > { %496 = vrot.lane.b32.xlu1 %v492_v16, %s1243_s9  ;;  %494 = vrot.lane.b32.xlu0 %v491_v17, %s1243_s9  ;;  %566 = vst [vmem:[#allocation1] ss:$2 sm:$0xff] %v1327_v2  ;;  %v1115_v17 = vld [vmem:[%s1482_s1 + $0x28] sm:$0xff] }
  0x41   : > { %498 = vrot.lane.b32.xlu2 %v493_v14, %s1243_s9 }
  0x45   : > { %v639_v22 = vld.sshfl [vmem:[#allocation1 + $0x10] sm:$0xff pattern:$0x75316420] }
  0x46   : > { %712 = vst [vmem:[#allocation1 + $0x10] ss:$2 sm:$0xff] %v707_v19 }
  0x47   : > { %v570_v20 = vld.sshfl [vmem:[#allocation1 + $0x8] sm:$0xff pattern:$0x75316420]  ;;  %v569_v21 = vld.sshfl [vmem:[#allocation1] sm:$0xff pattern:$0x75316420] }
  0x48   : > { %574 = vrot.lane.b32.xlu1 %v570_v20, %s1244_s10  ;;  %572 = vrot.lane.b32.xlu0 %v569_v21, %s1244_s10  ;;  %634 = vst [vmem:[#allocation1] ss:$2 sm:$0xff] %v1327_v2 }
  0x49   : > { %576 = vrot.lane.b32.xlu2 %v571_v18, %s1244_s10 }
  0x4d   : > { %v715_v26 = vld.sshfl [vmem:[#allocation1 + $0x10] sm:$0xff pattern:$0x75316420] }
  0x4e   : > { %790 = vst [vmem:[#allocation1 + $0x10] ss:$2 sm:$0xff] %v783_v23 }
  0x4f   : > { %v638_v24 = vld.sshfl [vmem:[#allocation1 + $0x8] sm:$0xff pattern:$0x75316420]  ;;  %v637_v25 = vld.sshfl [vmem:[#allocation1] sm:$0xff pattern:$0x75316420] }
  0x50   : > { %642 = vrot.lane.b32.xlu1 %v638_v24, %s1245_s11  ;;  %640 = vrot.lane.b32.xlu0 %v637_v25, %s1245_s11  ;;  %710 = vst [vmem:[#allocation1] ss:$2 sm:$0xff] %v1327_v2  ;;  %v1120_v25 = vld [vmem:[%s1482_s1 + $0x30] sm:$0xff] }
  0x51   : > { %644 = vrot.lane.b32.xlu2 %v639_v22, %s1245_s11 }
  0x55   : > { %v793_v30 = vld.sshfl [vmem:[#allocation1 + $0x10] sm:$0xff pattern:$0x75316420] }
  0x56   : > { %858 = vst [vmem:[#allocation1 + $0x10] ss:$2 sm:$0xff] %v853_v27 }
  0x57   : > { %v714_v28 = vld.sshfl [vmem:[#allocation1 + $0x8] sm:$0xff pattern:$0x75316420]  ;;  %v713_v29 = vld.sshfl [vmem:[#allocation1] sm:$0xff pattern:$0x75316420] }
  0x58   : > { %718 = vrot.lane.b32.xlu1 %v714_v28, %s1246_s12  ;;  %716 = vrot.lane.b32.xlu0 %v713_v29, %s1246_s12  ;;  %788 = vst [vmem:[#allocation1] ss:$2 sm:$0xff] %v1327_v2 }
  0x59   : > { %720 = vrot.lane.b32.xlu2 %v715_v26, %s1246_s12 }
  0x5d   : > { %v861_v33 = vld.sshfl [vmem:[#allocation1 + $0x10] sm:$0xff pattern:$0x75316420] }
  0x5f   : > { %v792_v31 = vld.sshfl [vmem:[#allocation1 + $0x8] sm:$0xff pattern:$0x75316420]  ;;  %v791_v32 = vld.sshfl [vmem:[#allocation1] sm:$0xff pattern:$0x75316420] }
  0x60   : > { %796 = vrot.lane.b32.xlu1 %v792_v31, %s1247_s13  ;;  %794 = vrot.lane.b32.xlu0 %v791_v32, %s1247_s13  ;;  %856 = vst [vmem:[#allocation1] ss:$2 sm:$0xff] %v1327_v2  ;;  %v1125_v31 = vld [vmem:[%s1482_s1 + $0x38] sm:$0xff] }
  0x61   : > { %798 = vrot.lane.b32.xlu2 %v793_v30, %s1247_s13 }
  0x67   : > { %v860_v34 = vld.sshfl [vmem:[#allocation1 + $0x8] sm:$0xff pattern:$0x75316420]  ;;  %v859_v35 = vld.sshfl [vmem:[#allocation1] sm:$0xff pattern:$0x75316420] }
  0x68   : > { %864 = vrot.lane.b32.xlu1 %v860_v34, %s1248_s14  ;;  %862 = vrot.lane.b32.xlu0 %v859_v35, %s1248_s14 }
  0x69   : > { %866 = vrot.lane.b32.xlu2 %v861_v33, %s1248_s14 }
  0x88   : > { %v423_v45 = vpop.permute.xlu2 %422 }
  0x93   : > { %v421_v47 = vpop.permute.xlu2 %420 }
  0x94   : > { %v426_v51 = vsel %vm424_vm5, %v421_v47, %v423_v45 }
  0x95   : > { %v430_v61 = vsel %vm1374_vm8, %v426_v51, 0.0 }
  0x98   : > { %v302_v48 = vpop.permute.xlu1 %301 }
  0x9b   : > { %v499_v50 = vpop.permute.xlu2 %498 }
  0xa2   : > { %v298_v49 = vpop.permute.xlu0 %297 }
  0xa3   : > { %v577_v62 = vpop.permute.xlu2 %576 }
  0xaa   : > { %v300_v54 = vpop.permute.xlu0 %299  ;;  %v419_v55 = vpop.permute.xlu1 %418 }
  0xab   : > { %v425_v56 = vsel %vm424_vm5, %v419_v55, %v421_v47  ;;  %v304_v57 = vsel %vm303_vm6, %v298_v49, %v300_v54  ;;  %v305_v58 = vsel %vm303_vm6, %v300_v54, %v302_v48  ;;  %v645_v7 = vpop.permute.xlu2 %644 }
  0xac   : > { %1092 = vmatpush.msk.msra.mxu0 %vm310_vm3, %v304_v57  ;;  %1094 = vmatpush.msk.msra.mxu1 %vm310_vm3, %v305_v58  ;;  %v429_v60 = vsel %vm1370_vm7, %v425_v56, 0.0  ;;  %v381_v44 = vpop.f32.mrf.mxu2 }
  0xad   : > { %1093 = vmatmul.msk.f32.vlgmr.msra.gmra.mxu0 %vm306_vm4, %v1091_v59  ;;  %1095 = vmatmul.msk.f32.vlgmr.msra.gmra.mxu1 %vm306_vm4, %v1091_v59  ;;  %v401_v45 = vpop.f32.mrf.mxu3 }
  0xae   : > { %1101 = vmatpush.msk.msrb.mxu0 %vm310_vm3, %v429_v60  ;;  %1103 = vmatpush.msk.msrb.mxu1 %vm310_vm3, %v430_v61 }
  0xb2   : > { %v497_v63 = vpop.permute.xlu1 %496  ;;  %v495_v0 = vpop.permute.xlu0 %494 }
  0xb3   : > { %v502_v1 = vsel %vm500_vm9, %v497_v63, %v499_v50  ;;  %v501_v2 = vsel %vm500_vm9, %v495_v0, %v497_v63  ;;  %v721_v20 = vpop.permute.xlu2 %720 }
  0xb4   : > { %v505_v4 = vsel %vm1349_vm1, %v501_v2, 0.0  ;;  %v506_v5 = vsel %vm1353_vm2, %v502_v1, 0.0 }
  0xb5   : > { %1106 = vmatpush.msk.msrb.mxu2 %vm310_vm3, %v505_v4  ;;  %1108 = vmatpush.msk.msrb.mxu3 %vm310_vm3, %v506_v5 }
  0xb6   : > { %1102 = vmatmul.msk.f32.vlgmr.msrb.gmra.mxu0 %vm306_vm4, %v1100_v3  ;;  %1104 = vmatmul.msk.f32.vlgmr.msrb.gmra.mxu1 %vm306_vm4, %v1100_v3 }
  0xb7   : > { %1107 = vmatmul.msk.f32.vlgmr.msrb.gmra.mxu2 %vm306_vm4, %v1105_v6  ;;  %1109 = vmatmul.msk.f32.vlgmr.msrb.gmra.mxu3 %vm306_vm4, %v1105_v6 }
  0xba   : > { %v575_v8 = vpop.permute.xlu1 %574  ;;  %v573_v9 = vpop.permute.xlu0 %572 }
  0xbb   : > { %v580_v10 = vsel %vm578_vm10, %v575_v8, %v577_v62  ;;  %v579_v11 = vsel %vm578_vm10, %v573_v9, %v575_v8  ;;  %v799_v28 = vpop.permute.xlu2 %798 }
  0xbc   : > { %1111 = vmatpush.msk.msra.mxu0 %vm310_vm3, %v579_v11  ;;  %1113 = vmatpush.msk.msra.mxu1 %vm310_vm3, %v580_v10 }
  0xbe   : > { %1112 = vmatmul.msk.f32.vlgmr.msra.gmra.mxu0 %vm306_vm4, %v1110_v12  ;;  %1114 = vmatmul.msk.f32.vlgmr.msra.gmra.mxu1 %vm306_vm4, %v1110_v12 }
  0xc2   : > { %v643_v13 = vpop.permute.xlu1 %642  ;;  %v641_v14 = vpop.permute.xlu0 %640 }
  0xc3   : > { %v648_v15 = vsel %vm646_vm11, %v643_v13, %v645_v7  ;;  %v647_v16 = vsel %vm646_vm11, %v641_v14, %v643_v13  ;;  %v867_v34 = vpop.permute.xlu2 %866 }
  0xc4   : > { %v652_v18 = vsel %vm1374_vm8, %v648_v15, 0.0  ;;  %v651_v19 = vsel %vm1370_vm7, %v647_v16, 0.0  ;;  %v933_v16 = vld [vmem:[#allocation3] sm:$0xff] }
  0xc5   : > { %1116 = vmatpush.msk.msra.mxu2 %vm310_vm3, %v651_v19  ;;  %1118 = vmatpush.msk.msra.mxu3 %vm310_vm3, %v652_v18  ;;  %v940_v18 = vld [vmem:[#allocation4] sm:$0xff] }
  0xc6   : > { %1117 = vmatmul.msk.f32.vlgmr.msra.gmra.mxu2 %vm306_vm4, %v1115_v17  ;;  %1119 = vmatmul.msk.f32.vlgmr.msra.gmra.mxu3 %vm306_vm4, %v1115_v17 }
  0xca   : > { %v719_v21 = vpop.permute.xlu1 %718  ;;  %v717_v22 = vpop.permute.xlu0 %716 }
  0xcb   : > { %v724_v23 = vsel %vm722_vm12, %v719_v21, %v721_v20  ;;  %v723_v24 = vsel %vm722_vm12, %v717_v22, %v719_v21 }
  0xcc   : > { %v728_v26 = vsel %vm1353_vm2, %v724_v23, 0.0  ;;  %v727_v27 = vsel %vm1349_vm1, %v723_v24, 0.0 }
  0xcd   : > { %1121 = vmatpush.msk.msrb.mxu0 %vm310_vm3, %v727_v27  ;;  %1123 = vmatpush.msk.msrb.mxu1 %vm310_vm3, %v728_v26 }
  0xce   : > { %1122 = vmatmul.msk.f32.vlgmr.msrb.gmra.mxu0 %vm306_vm4, %v1120_v25  ;;  %1124 = vmatmul.msk.f32.vlgmr.msrb.gmra.mxu1 %vm306_vm4, %v1120_v25 }
  0xd2   : > { %v797_v29 = vpop.permute.xlu1 %796  ;;  %v795_v30 = vpop.permute.xlu0 %794 }
  0xd3   : > { %v802_v32 = vsel %vm800_vm13, %v797_v29, %v799_v28  ;;  %v801_v33 = vsel %vm800_vm13, %v795_v30, %v797_v29 }
  0xd4   : > { %1126 = vmatpush.msk.msrb.mxu2 %vm310_vm3, %v801_v33  ;;  %1128 = vmatpush.msk.msrb.mxu3 %vm310_vm3, %v802_v32 }
  0xd5   : > { %1127 = vmatmul.msk.f32.vlgmr.msrb.gmra.mxu2 %vm306_vm4, %v1125_v31  ;;  %1129 = vmatmul.msk.f32.vlgmr.msrb.gmra.mxu3 %vm306_vm4, %v1125_v31 }
  0xda   : > { %v865_v35 = vpop.permute.xlu1 %864  ;;  %v863_v36 = vpop.permute.xlu0 %862 }
  0xdb   : > { %v870_v37 = vsel %vm868_vm14, %v865_v35, %v867_v34  ;;  %v869_v38 = vsel %vm868_vm14, %v863_v36, %v865_v35 }
  0xdc   : > { %v874_v40 = vsel %vm1374_vm8, %v870_v37, 0.0  ;;  %v873_v41 = vsel %vm1370_vm7, %v869_v38, 0.0 }
  0xdd   : > { %1131 = vmatpush.msk.msra.mxu0 %vm310_vm3, %v873_v41  ;;  %1133 = vmatpush.msk.msra.mxu1 %vm310_vm3, %v874_v40 }
  0xde   : > { %1132 = vmatmul.msk.f32.vlgmr.msra.gmra.mxu0 %vm306_vm4, %v1130_v39  ;;  %1134 = vmatmul.msk.f32.vlgmr.msra.gmra.mxu1 %vm306_vm4, %v1130_v39 }
 0x12a   : > { %v332_v42 = vpop.f32.mrf.mxu0  ;;  %v352_v43 = vpop.f32.mrf.mxu1 }
 0x12b   : > { %v382_v48 = vadd.f32 %v381_v44, %v332_v42  ;;  %v402_v49 = vadd.f32 %v401_v45, %v352_v43 }
 0x133   : > { %v459_v46 = vpop.f32.mrf.mxu0  ;;  %v479_v47 = vpop.f32.mrf.mxu1 }
 0x134   : > { %v482_v52 = vadd.f32 %v459_v46, %v382_v48  ;;  %v483_v53 = vadd.f32 %v479_v47, %v402_v49 }
 0x13a   : > { %v535_v50 = vpop.f32.mrf.mxu2  ;;  %v555_v51 = vpop.f32.mrf.mxu3 }
 0x13b   : > { %v605_v54 = vpop.f32.mrf.mxu0  ;;  %v625_v55 = vpop.f32.mrf.mxu1  ;;  %v558_v56 = vadd.f32 %v535_v50, %v482_v52  ;;  %v559_v57 = vadd.f32 %v555_v51, %v483_v53 }
 0x13d   : > { %v628_v60 = vadd.f32 %v605_v54, %v558_v56  ;;  %v629_v61 = vadd.f32 %v625_v55, %v559_v57 }
 0x149   : > { %v681_v58 = vpop.f32.mrf.mxu2  ;;  %v701_v59 = vpop.f32.mrf.mxu3 }
 0x14a   : > { %v704_v62 = vadd.f32 %v681_v58, %v628_v60  ;;  %v705_v63 = vadd.f32 %v701_v59, %v629_v61 }
 0x14b   : > { %v757_v0 = vpop.f32.mrf.mxu0  ;;  %v777_v1 = vpop.f32.mrf.mxu1 }
 0x14c   : > { %v780_v2 = vadd.f32 %v757_v0, %v704_v62  ;;  %v781_v3 = vadd.f32 %v777_v1, %v705_v63 }
 0x158   : > { %v827_v4 = vpop.f32.mrf.mxu2  ;;  %v847_v5 = vpop.f32.mrf.mxu3 }
 0x159   : > { %v850_v6 = vadd.f32 %v827_v4, %v780_v2  ;;  %v851_v7 = vadd.f32 %v847_v5, %v781_v3 }
 0x15b   : > { %v903_v8 = vpop.f32.mrf.mxu0  ;;  %v923_v9 = vpop.f32.mrf.mxu1 }
 0x15c   : > { %v926_v10 = vadd.f32 %v903_v8, %v850_v6  ;;  %v927_v11 = vadd.f32 %v923_v9, %v851_v7 }
 0x15e   : > { %931 = vst [vmem:[%s930_s23] sm:$0xff] %v926_v10  ;;  %v934_v12 = vadd.f32 %v927_v11, %v926_v10  ;;  %v941_v13 = vmul.f32 %v926_v10, %v926_v10  ;;  %v942_v14 = vmul.f32 %v927_v11, %v927_v11 }
 0x15f   : > { %932 = vst [vmem:[%s930_s23 + $0x8] sm:$0xff] %v927_v11 }
 0x160   : > { %935 = vadd.xlane.f32.xlu0 %v934_v12  ;;  %v943_v15 = vadd.f32 %v942_v14, %v941_v13 }
 0x162   : > { %944 = vadd.xlane.f32.xlu1 %v943_v15 }
 0x1d3   : > { %v936_v17 = vpop.xlane.xlu0 %935 }
 0x1d4   : > { %v937_v19 = vadd.f32 %v936_v17, %v933_v16 }
 0x1d5   : > { %v945_v20 = vpop.xlane.xlu1 %944 }
 0x1d6   : > { %939 = vst.msk [vmem:[#allocation3] sm:$0xff] %vm938_vm15, %v937_v19  ;;  %v946_v21 = vadd.f32 %v945_v20, %v940_v18 }
 0x1d8   : > { %947 = vst.msk [vmem:[#allocation4] sm:$0xff] %vm938_vm15, %v946_v21 }
 0x1d9 PF: > { %p1137_p9 = scmp.ne.s32.totalorder %s1226_s16, 1 }
 0x1da   : > { %p1138_p10 = scmp.ne.s32.totalorder (!%p1137_p9), %s1222_s15, 0 }
 0x1db   : > { %951 = sbr.rel (%p1137_p9) target bundleno = 653 (0x28d), region = 48 }
 0x1e0   : > { %955 = sbr.rel (%p1138_p10) target bundleno = 521 (0x209), region = 52 }
 0x1e5   : > { %v956_v22 = vld [vmem:[#allocation3] sm:$0xff]  ;;  %v958_v23 = vld [vmem:[#allocation4] sm:$0xff]  ;;  %v963_v35 = vld [vmem:[%s1483_s2] sm:$0xff]  ;;  %vm976_vm3 = vcmask 7168  }
 0x1e6   : > { %v957_v24 = vmul.f32 0.001953125, %v956_v22  ;;  %v959_v25 = vmul.f32 0.001953125, %v958_v23  ;;  %v978_v39 = vld [vmem:[%s1484_s3] sm:$0xff] }
 0x1e8   : > { %v960_v26 = vmul.f32 %v957_v24, %v957_v24 }
 0x1ea   : > { %v961_v27 = vsub.f32 %v959_v25, %v960_v26 }
 0x1ec   : > { %v962_v28 = vmax.f32 %v961_v27, 0.0 }
 0x1ee   : > { %v964_v29 = vadd.f32 1e-05, %v962_v28 }
 0x1f0   : > { %1197 = vrsqrt.f32 %v964_v29  ;;  %vm971_vm0 = vweird.f32 %v964_v29 }
 0x1f6   : > { %v1198_v30 = vpop.eup %1197 }
 0x1f7   : > { %v966_v31 = vmul.f32 %v1198_v30, %v964_v29  ;;  %vm972_vm1 = vweird.f32 %v1198_v30 }
 0x1f8   : > { %vm973_vm2 = vmor %vm971_vm0, %vm972_vm1 }
 0x1f9   : > { %v967_v32 = vmul.f32 %v1198_v30, %v966_v31 }
 0x1fb   : > { %v968_v33 = vmul.f32 0.5, %v967_v32 }
 0x1fd   : > { %v969_v34 = vsub.f32 1.5, %v968_v33 }
 0x1ff   : > { %v970_v36 = vmul.f32 %v1198_v30, %v969_v34 }
 0x201   : > { %v974_v37 = vsel %vm973_vm2, %v1198_v30, %v970_v36 }
 0x202   : > { %v975_v38 = vmul.f32 %v974_v37, %v963_v35 }
 0x204   : > { %977 = vst.msk [vmem:[#allocation5] sm:$0xff] %vm976_vm3, %v975_v38  ;;  %v979_v40 = vmul.f32 %v975_v38, %v957_v24 }
 0x206   : > { %v980_v41 = vsub.f32 %v978_v39, %v979_v40 }
 0x208   : > { %981 = vst.msk [vmem:[#allocation6] sm:$0xff] %vm976_vm3, %v980_v41 }
 0x209 PF: > { %v1249_v43 = vmov 0   ;;  %s1145_s27 = sshll.u32 %s1222_s15, 4 }
 0x20a   : > { %1199 = vset.pattern.permute.xlu0 %v1249_v43  ;;  %s984_s28 = scalar_lea.vmem [#allocation2], %s1145_s27 }
 0x20b   : > { %v987_v42 = vld [vmem:[#allocation5] sm:$0xff]  ;;  %v985_v46 = vld [vmem:[%s984_s28] sm:$0xff]  ;;  %v986_v47 = vld [vmem:[%s984_s28 + $0x8] sm:$0xff] }
 0x20c   : > { %990 = vperm.xlu0 %1199, %v987_v42  }
 0x20f   : > { %v995_v44 = vld [vmem:[#allocation6] sm:$0xff] }
 0x214   : > { %998 = vperm.xlu0 %1199, %v995_v44  }
 0x27e   : > { %v991_v45 = vpop.permute.xlu0 %990 }
 0x27f   : > { %v993_v48 = vmul.f32 %v991_v45, %v985_v46  ;;  %v994_v49 = vmul.f32 %v991_v45, %v986_v47 }
 0x286   : > { %v999_v50 = vpop.permute.xlu0 %998 }
 0x287   : > { %v1001_v51 = vadd.f32 %v999_v50, %v993_v48  ;;  %v1002_v52 = vadd.f32 %v999_v50, %v994_v49 }
 0x289   : > { %v1003_v53 = vmax.f32 %v1001_v51, 0.0  ;;  %v1004_v54 = vmax.f32 %v1002_v52, 0.0 }
 0x28b   : > { %1005 = vst [vmem:[%s1316_s29] sm:$0xff] %v1003_v53 }
 0x28c   : > { %1006 = vst [vmem:[%s1316_s29 + $0x8] sm:$0xff] %v1004_v54 }
 0x28d PF: > { %s14_s19 = sadd.s32 1, %s1238_s19   ;;  %s1494_s15 = smov %s1230_s17 }
 0x28e   : > { %p11_p11 = scmp.ge.s32.totalorder %s14_s19, 6   ;;  %s1495_s16 = smov %s1234_s18 }
 0x28f   : > { %s1496_s17 = smov %s1499_s20  ;;  %s1497_s18 = smov %s1503_s21 }
 0x290   :  { %13 = sbr.rel (!%p11_p11) target bundleno = 3 (0x3), region = 100 }

</bundles_post_ra>
